<compile_context>
chip_gen: v7x
topology: tpu7x:2x2x1
jax: 0.10.0
libtpu: 0.0.40
codegen_flags: <defaults>
</compile_context>

<pallas_src>
import jax
import jax.numpy as jnp
from jax.experimental import pallas as pl
from jax.experimental.pallas import tpu as pltpu


def _round_up(x, m):
    return (x + m - 1) // m * m


def _reparam_kernel(mu_f_ref, lv_f_ref, eps_f_ref,
                    mu_o_ref, lv_o_ref, eps_o_ref,
                    z_f_ref, z_o_ref):
    # z = mu + eps * exp(0.5 * logvar) for both latent streams, fused into one
    # grid step.  Pure VPU/EUP elementwise work on (tile_b, d) blocks.
    z_f_ref[...] = (mu_f_ref[...]
                    + eps_f_ref[...] * jnp.exp(0.5 * lv_f_ref[...])
                    ).astype(z_f_ref.dtype)
    z_o_ref[...] = (mu_o_ref[...]
                    + eps_o_ref[...] * jnp.exp(0.5 * lv_o_ref[...])
                    ).astype(z_o_ref.dtype)


def latent_combiner_forward(mu_fundus, logvar_fundus, mu_oct, logvar_oct, *, key):
    """Pallas implementation of LatentCombiner.forward.

    eps ~ N(0, 1) is drawn wrapper-side with jax.random.normal (deterministic
    given `key`) and passed to the kernel as a regular input, so the result is
    reproducible and the kernel runs on real TPUs and in interpret mode alike.
    """
    B, d_f = mu_fundus.shape
    B_o, d_o = mu_oct.shape
    assert B == B_o, "batch dims must match"
    dtype = mu_fundus.dtype

    k_f, k_o = jax.random.split(key)
    eps_f = jax.random.normal(k_f, (B, d_f), dtype=dtype)
    eps_o = jax.random.normal(k_o, (B, d_o), dtype=dtype)

    # --- batch tiling -------------------------------------------------------
    # Block feature dims are the full d_f / d_o (satisfies the (8,128) rule by
    # equalling the array dim).  Batch tile is a multiple of 8, sized from a
    # ~24 MiB double-buffered VMEM budget so it fits every generation's scoped
    # limit while amortizing the ~0.35 us per-step pipeline overhead.
    if B < 8:
        tile_b = B                                   # block == full batch dim
    else:
        itemsize = jnp.dtype(dtype).itemsize
        D = d_f + d_o
        budget = 24 * 1024 * 1024                    # pipelined-buffer budget
        bytes_per_row = 2 * 4 * D * itemsize         # 2 bufs x (3 in + 1 out)
        rows = max(8, (budget // bytes_per_row) // 8 * 8)
        tile_b = min(rows, 4096, _round_up(B, 8))
        # Keep both v7x TensorCores busy when there is enough work.
        if B >= 16 and pl.cdiv(B, tile_b) < 2:
            tile_b = max(8, _round_up(pl.cdiv(B, 2), 8))
    num_tiles = pl.cdiv(B, tile_b)

    spec_f = pl.BlockSpec((tile_b, d_f), lambda i: (i, 0))
    spec_o = pl.BlockSpec((tile_b, d_o), lambda i: (i, 0))

    z_f, z_o = pl.pallas_call(
        _reparam_kernel,
        out_shape=(jax.ShapeDtypeStruct((B, d_f), dtype),
                   jax.ShapeDtypeStruct((B, d_o), dtype)),
        grid=(num_tiles,),
        in_specs=[spec_f, spec_f, spec_f, spec_o, spec_o, spec_o],
        out_specs=(spec_f, spec_o),
        compiler_params=pltpu.CompilerParams(
            dimension_semantics=("parallel",),
            vmem_limit_bytes=48 * 1024 * 1024),
    )(mu_fundus, logvar_fundus, eps_f, mu_oct, logvar_oct, eps_o)

    return [z_f, z_o]


def init_latent_combiner_params(key, latent_dim_fundus, latent_dim_oct):
    """Deterministic init of the fc layer parameters (unused in forward)."""
    d = latent_dim_fundus + latent_dim_oct
    kw, kb = jax.random.split(key)
    bound = 1.0 / jnp.sqrt(d)
    w = jax.random.uniform(kw, (d, d), minval=-bound, maxval=bound, dtype=jnp.float32)
    b = jax.random.uniform(kb, (d,), minval=-bound, maxval=bound, dtype=jnp.float32)
    # TODO(synk): fc is never applied in the reference forward(); kept for parity only.
    return {"fc_weight": w, "fc_bias": b}


if __name__ == "__main__":
    key = jax.random.PRNGKey(0)
    k_params, k_mu_f, k_lv_f, k_mu_o, k_lv_o, k_eps = jax.random.split(key, 6)

    batch = 2
    latent_dim_fundus = 32
    latent_dim_oct = 32

    params = init_latent_combiner_params(k_params, latent_dim_fundus, latent_dim_oct)

    mu_fundus = jax.random.normal(k_mu_f, (batch, latent_dim_fundus), dtype=jnp.float32)
    logvar_fundus = jax.random.normal(k_lv_f, (batch, latent_dim_fundus), dtype=jnp.float32)
    mu_oct = jax.random.normal(k_mu_o, (batch, latent_dim_oct), dtype=jnp.float32)
    logvar_oct = jax.random.normal(k_lv_o, (batch, latent_dim_oct), dtype=jnp.float32)

    z_combined = latent_combiner_forward(
        mu_fundus, logvar_fundus, mu_oct, logvar_oct, key=k_eps)
    jax.block_until_ready(z_combined)

    assert z_combined[0].shape == (batch, latent_dim_fundus)
    assert z_combined[1].shape == (batch, latent_dim_oct)
    assert bool(jnp.all(jnp.isfinite(z_combined[0])))
    assert bool(jnp.all(jnp.isfinite(z_combined[1])))

    # Cross-check against the plain-JAX reference with the same eps stream.
    k_f, k_o = jax.random.split(k_eps)
    eps_f = jax.random.normal(k_f, mu_fundus.shape, dtype=jnp.float32)
    eps_o = jax.random.normal(k_o, mu_oct.shape, dtype=jnp.float32)
    ref_f = mu_fundus + eps_f * jnp.exp(0.5 * logvar_fundus)
    ref_o = mu_oct + eps_o * jnp.exp(0.5 * logvar_oct)
    assert bool(jnp.allclose(z_combined[0], ref_f, atol=1e-6, rtol=1e-6))
    assert bool(jnp.allclose(z_combined[1], ref_o, atol=1e-6, rtol=1e-6))

    print("KERNEL_OK")
</pallas_src>

<mosaic_0001>
module attributes {stable_mosaic.version = 11 : i64} {
  func.func @_reparam_kernel(%arg0: i32, %arg1: memref<2x32xf32, #tpu.memory_space<vmem>>, %arg2: memref<2x32xf32, #tpu.memory_space<vmem>>, %arg3: memref<2x32xf32, #tpu.memory_space<vmem>>, %arg4: memref<2x32xf32, #tpu.memory_space<vmem>>, %arg5: memref<2x32xf32, #tpu.memory_space<vmem>>, %arg6: memref<2x32xf32, #tpu.memory_space<vmem>>, %arg7: memref<2x32xf32, #tpu.memory_space<vmem>>, %arg8: memref<2x32xf32, #tpu.memory_space<vmem>>) attributes {dimension_semantics = [#tpu.dimension_semantics<parallel>], iteration_bounds = array<i64: 1>, scalar_prefetch = 0 : i64, scratch_operands = 0 : i64, tpu.core_type = #tpu.core_type<tc>, window_params = [{transform_indices = @transform_0, window_bounds = array<i64: 2, 32>}, {transform_indices = @transform_1, window_bounds = array<i64: 2, 32>}, {transform_indices = @transform_2, window_bounds = array<i64: 2, 32>}, {transform_indices = @transform_3, window_bounds = array<i64: 2, 32>}, {transform_indices = @transform_4, window_bounds = array<i64: 2, 32>}, {transform_indices = @transform_5, window_bounds = array<i64: 2, 32>}, {transform_indices = @transform_6, window_bounds = array<i64: 2, 32>}, {transform_indices = @transform_7, window_bounds = array<i64: 2, 32>}]} {
    %c0 = arith.constant 0 : index
    %c0_0 = arith.constant 0 : index
    %0 = vector.load %arg1[%c0, %c0_0] : memref<2x32xf32, #tpu.memory_space<vmem>>, vector<2x32xf32>
    %c0_1 = arith.constant 0 : index
    %c0_2 = arith.constant 0 : index
    %1 = vector.load %arg3[%c0_1, %c0_2] : memref<2x32xf32, #tpu.memory_space<vmem>>, vector<2x32xf32>
    %c0_3 = arith.constant 0 : index
    %c0_4 = arith.constant 0 : index
    %2 = vector.load %arg2[%c0_3, %c0_4] : memref<2x32xf32, #tpu.memory_space<vmem>>, vector<2x32xf32>
    %cst = arith.constant 5.000000e-01 : f32
    %3 = vector.broadcast %cst : f32 to vector<2x32xf32>
    %4 = arith.mulf %3, %2 : vector<2x32xf32>
    %5 = math.exp %4 : vector<2x32xf32>
    %6 = arith.mulf %1, %5 : vector<2x32xf32>
    %7 = arith.addf %0, %6 : vector<2x32xf32>
    %c0_5 = arith.constant 0 : index
    %c0_6 = arith.constant 0 : index
    %8 = vector.load %arg7[%c0_5, %c0_6] : memref<2x32xf32, #tpu.memory_space<vmem>>, vector<2x32xf32>
    tpu.vector_store %arg7[%c0_5, %c0_6], %7 {strides = array<i32>} : memref<2x32xf32, #tpu.memory_space<vmem>>, vector<2x32xf32>,
    %c0_7 = arith.constant 0 : index
    %c0_8 = arith.constant 0 : index
    %9 = vector.load %arg4[%c0_7, %c0_8] : memref<2x32xf32, #tpu.memory_space<vmem>>, vector<2x32xf32>
    %c0_9 = arith.constant 0 : index
    %c0_10 = arith.constant 0 : index
    %10 = vector.load %arg6[%c0_9, %c0_10] : memref<2x32xf32, #tpu.memory_space<vmem>>, vector<2x32xf32>
    %c0_11 = arith.constant 0 : index
    %c0_12 = arith.constant 0 : index
    %11 = vector.load %arg5[%c0_11, %c0_12] : memref<2x32xf32, #tpu.memory_space<vmem>>, vector<2x32xf32>
    %cst_13 = arith.constant 5.000000e-01 : f32
    %12 = vector.broadcast %cst_13 : f32 to vector<2x32xf32>
    %13 = arith.mulf %12, %11 : vector<2x32xf32>
    %14 = math.exp %13 : vector<2x32xf32>
    %15 = arith.mulf %10, %14 : vector<2x32xf32>
    %16 = arith.addf %9, %15 : vector<2x32xf32>
    %c0_14 = arith.constant 0 : index
    %c0_15 = arith.constant 0 : index
    %17 = vector.load %arg8[%c0_14, %c0_15] : memref<2x32xf32, #tpu.memory_space<vmem>>, vector<2x32xf32>
    tpu.vector_store %arg8[%c0_14, %c0_15], %16 {strides = array<i32>} : memref<2x32xf32, #tpu.memory_space<vmem>>, vector<2x32xf32>,
    return
  }
  func.func @transform_0(%arg0: i32) -> (i32, i32) {
    %c0_i32 = arith.constant 0 : i32
    %c0_i32_0 = arith.constant 0 : i32
    return %arg0, %c0_i32 : i32, i32
  }
  func.func @transform_1(%arg0: i32) -> (i32, i32) {
    %c0_i32 = arith.constant 0 : i32
    %c0_i32_0 = arith.constant 0 : i32
    return %arg0, %c0_i32 : i32, i32
  }
  func.func @transform_2(%arg0: i32) -> (i32, i32) {
    %c0_i32 = arith.constant 0 : i32
    %c0_i32_0 = arith.constant 0 : i32
    return %arg0, %c0_i32 : i32, i32
  }
  func.func @transform_3(%arg0: i32) -> (i32, i32) {
    %c0_i32 = arith.constant 0 : i32
    %c0_i32_0 = arith.constant 0 : i32
    return %arg0, %c0_i32 : i32, i32
  }
  func.func @transform_4(%arg0: i32) -> (i32, i32) {
    %c0_i32 = arith.constant 0 : i32
    %c0_i32_0 = arith.constant 0 : i32
    return %arg0, %c0_i32 : i32, i32
  }
  func.func @transform_5(%arg0: i32) -> (i32, i32) {
    %c0_i32 = arith.constant 0 : i32
    %c0_i32_0 = arith.constant 0 : i32
    return %arg0, %c0_i32 : i32, i32
  }
  func.func @transform_6(%arg0: i32) -> (i32, i32) {
    %c0_i32 = arith.constant 0 : i32
    %c0_i32_0 = arith.constant 0 : i32
    return %arg0, %c0_i32 : i32, i32
  }
  func.func @transform_7(%arg0: i32) -> (i32, i32) {
    %c0_i32 = arith.constant 0 : i32
    %c0_i32_0 = arith.constant 0 : i32
    return %arg0, %c0_i32 : i32, i32
  }
}

</mosaic_0001>

<bundles_post_ra>
// kernel: tpu_custom_call.1
= control target key start
LH: loop header
LB: loop body
LE: loop exit
PB: predicated region body
PF: predicated region fallthrough
CT: control target
= control target key end

     0   :  { %13 = vsyncpa [#allocation3], 0  ;;  %s262_s0 = inlined_call_operand.hbm [shape: f32[2,32], index: 0, kind: input, shape index: {}]   ;;  %s263_s1 = inlined_call_operand.vmem [shape: f32[2,32], index: 1, kind: input, shape index: {}]   ;;  %s264_s2 = inlined_call_operand.vmem [shape: f32[2,32], index: 2, kind: input, shape index: {}]   ;;  %s265_s3 = inlined_call_operand.vmem [shape: f32[2,32], index: 3, kind: input, shape index: {}]   ;;  %s266_s4 = inlined_call_operand.vmem [shape: f32[2,32], index: 4, kind: input, shape index: {}]   ;;  %s267_s5 = inlined_call_operand.vmem [shape: f32[2,32], index: 5, kind: input, shape index: {}]   ;;  %s268_s6 = inlined_call_operand.hbm [shape: f32[2,32], index: 6, kind: output, shape index: {0}]   ;;  %s269_s7 = inlined_call_operand.hbm [shape: f32[2,32], index: 7, kind: output, shape index: {1}]  }
   0x1   :  { %14 = vsyncpa [#allocation4], 0 }
   0x2   :  { %15 = vsyncpa [#allocation7], 0  ;;  %s166_s24 = smov [#allocation2]   ;;  %s94_s28 = scalar_lea.hbm %s262_s0, 32 }
   0x3   :  { %s22_s25 = sshll.u32 %s166_s24, 4  ;;  %p95_p0 = scmp.ne.s32.totalorder %s262_s0, %s94_s28  ;;  %s23_s25 = int_to_ptr.vmem [resolvable:$true] %s22_s25 }
   0x4   :  { %p98_p1 = scmp.lt.u32.totalorder %s94_s28, %s262_s0 }
   0x6   :  { %p100_p2 = pnand %p98_p1, %p95_p0 }
   0x8   :  { %103 = shalt.err (!%p100_p2)
}
   0x9   :  { %s104_s10 = scalar_lea.vmem %s23_s25, 32  ;;  %p109_p4 = scmp.lt.s32.totalorder %s23_s25, %s23_s25 }
   0xa   :  { %p105_p3 = scmp.ne.s32.totalorder %s23_s25, %s104_s10  ;;  %p110_p5 = scmp.lt.s32.totalorder %s104_s10, %s104_s10 }
   0xc   :  { %p111_p6 = por %p110_p5, %p109_p4 }
   0xe   :  { %p112_p7 = pnand %p111_p6, %p105_p3 }
  0x10   :  { %115 = shalt.err (!%p112_p7)
}
  0x11   :  { %25 = dma.hbm_to_vmem [thread:$0]  %s262_s0, 32, %s23_s25, [#allocation3]  }
  0x12   :  { %160 = dma.done.wait [#allocation3], 32  }
  0x13   :  { %161 = vsyncadd [#allocation3], 4294967264  ;;  %v41_v0 = vld [vmem:[%s263_s1] sm:$0x3]  ;;  %s167_s1 = smov [#allocation5]   ;;  %vm47_vm0 = vcmask 254976  }
  0x14   :  { %v42_v1 = vmul.f32 0.5, %v41_v0  ;;  %v51_v2 = vld [vmem:[%s266_s4] sm:$0x3]  ;;  %s64_s20 = sshll.u32 %s167_s1, 4  ;;  %s168_s22 = smov [#allocation6]   ;;  %s65_s20 = int_to_ptr.vmem [resolvable:$true] %s64_s20 }
  0x15   :  { %v52_v4 = vmul.f32 0.5, %v51_v2  ;;  %v40_v6 = vld [vmem:[%s264_s2] sm:$0x3]  ;;  %s74_s23 = sshll.u32 %s168_s22, 4  ;;  %s116_s2 = scalar_lea.vmem %s65_s20, 32  ;;  %s75_s23 = int_to_ptr.vmem [resolvable:$true] %s74_s23 }
  0x16   :  { %v43_v3 = vmul.f32 1.442695, %v42_v1  ;;  %v39_v8 = vld [vmem:[#allocation2] sm:$0x3]  ;;  %p117_p8 = scmp.ne.s32.totalorder %s65_s20, %s116_s2  ;;  %p121_p9 = scmp.lt.s32.totalorder %s65_s20, %s65_s20 }
  0x17   :  { %v53_v5 = vmul.f32 1.442695, %v52_v4  ;;  %v50_v9 = vld [vmem:[%s267_s5] sm:$0x3]  ;;  %p122_p10 = scmp.lt.s32.totalorder %s116_s2, %s116_s2 }
  0x18   :  { %90 = vpow2.f32 %v43_v3  ;;  %v49_v12 = vld [vmem:[%s265_s3] sm:$0x3] }
  0x19   :  { %92 = vpow2.f32 %v53_v5  ;;  %p123_p11 = por %p122_p10, %p121_p9 }
  0x1b   :  { %p124_p12 = pnand %p123_p11, %p117_p8 }
  0x22   :  { %v91_v7 = vpop.eup %90 }
  0x23   :  { %v45_v10 = vmul.f32 %v91_v7, %v40_v6  ;;  %v93_v11 = vpop.eup %92 }
  0x24   :  { %v55_v14 = vmul.f32 %v93_v11, %v50_v9 }
  0x25   :  { %v46_v13 = vadd.f32 %v45_v10, %v39_v8 }
  0x26   :  { %v56_v15 = vadd.f32 %v55_v14, %v49_v12 }
  0x27   :  { %48 = vst.msk [vmem:[#allocation5] sm:$0x3] %vm47_vm0, %v46_v13 }
  0x28   :  { %127 = shalt.err (!%p124_p12)
}
  0x29   :  { %s128_s3 = scalar_lea.hbm %s268_s6, 32 }
  0x2a   :  { %p129_p13 = scmp.ne.s32.totalorder %s268_s6, %s128_s3  ;;  %p132_p0 = scmp.lt.u32.totalorder %s128_s3, %s268_s6 }
  0x2c   :  { %p134_p1 = pnand %p132_p0, %p129_p13 }
  0x2e   :  { %137 = shalt.err (!%p134_p1)
}
  0x2f   :  { %67 = dma.vmem_to_hbm [thread:$0]  %s65_s20, 32, %s268_s6, [#allocation4]   ;;  %57 = vst.msk [vmem:[#allocation6] sm:$0x3] %vm47_vm0, %v56_v15 }
  0x30   :  { %s138_s8 = scalar_lea.vmem %s75_s23, 32  ;;  %p143_p3 = scmp.lt.s32.totalorder %s75_s23, %s75_s23 }
  0x31   :  { %p139_p2 = scmp.ne.s32.totalorder %s75_s23, %s138_s8  ;;  %p144_p4 = scmp.lt.s32.totalorder %s138_s8, %s138_s8 }
  0x33   :  { %p145_p5 = por %p144_p4, %p143_p3 }
  0x35   :  { %p146_p6 = pnand %p145_p5, %p139_p2 }
  0x37   :  { %149 = shalt.err (!%p146_p6)
}
  0x38   :  { %s150_s11 = scalar_lea.hbm %s269_s7, 32 }
  0x39   :  { %p151_p7 = scmp.ne.s32.totalorder %s269_s7, %s150_s11  ;;  %p154_p8 = scmp.lt.u32.totalorder %s150_s11, %s269_s7 }
  0x3b   :  { %p156_p9 = pnand %p154_p8, %p151_p7 }
  0x3d   :  { %159 = shalt.err (!%p156_p9)
}
  0x3e   :  { %77 = dma.vmem_to_hbm [thread:$0]  %s75_s23, 32, %s269_s7, [#allocation7]  }
  0x3f   :  { %162 = dma.done.wait [#allocation4], 32  }
  0x40   :  { %163 = vsyncadd [#allocation4], 4294967264 }
  0x41   :  { %164 = dma.done.wait [#allocation7], 32  }
  0x42   :  { %165 = vsyncadd [#allocation7], 4294967264 }
  0x43   :  { %84 = vsyncpa [#allocation3], 1 }
  0x44   :  { %85 = vsyncpa [#allocation4], 1 }
  0x45   :  { %86 = vsyncpa [#allocation7], 1 }

</bundles_post_ra>
